<compile_context>
chip_gen: v5e
topology: v5e:2x2
jax: 0.10.0
libtpu: 0.0.40
codegen_flags: <defaults>
</compile_context>

<pallas_src>
import jax
import jax.numpy as jnp
from jax.experimental import pallas as pl
from jax.experimental.pallas import tpu as pltpu

_LANE = 128
_W_CANDIDATES = (8192, 4096, 2048, 1024, 512, 256, 128)
_MIN_BLOCK_BYTES = 1 << 20          # never shrink blocks below ~1 MiB when rebalancing


def _cdiv(a, b):
    return -(-a // b)


def _round_up(a, b):
    return _cdiv(a, b) * b


def _min_sublanes(dtype):
    # Native sublane tile per floating dtype: f32 -> 8, bf16/f16 -> 16.
    return {4: 8, 2: 16}.get(jnp.dtype(dtype).itemsize, 8)


def _block_budget():
    """(per-block byte target, vmem_limit_bytes), generation-aware.

    v5e/v6e sit on the HBM-roofline plateau by ~2-4 MiB blocks; v7x's ~2.3x faster
    HBM wants bigger blocks (detected via its smaller 64 MiB VMEM). The vmem limit
    covers double-buffered in+out blocks with headroom on every generation.
    """
    target, limit = 4 << 20, 32 << 20
    try:
        if pltpu.get_tpu_info().vmem_capacity_bytes <= (64 << 20):   # v7x-class
            target, limit = 6 << 20, 40 << 20
    except Exception:
        pass                                   # interpret mode / old runtime: keep defaults
    return target, limit


def _tile_rows(rows, row_bytes, min_sub, block_bytes):
    """Rows per block: ~block_bytes, a sublane multiple, no exact-divisor shrinking."""
    if rows < min_sub or rows * row_bytes <= block_bytes:
        return rows                            # single full block (block dim == array dim is legal)
    tile = (block_bytes // row_bytes) // min_sub * min_sub
    tile = max(tile, min_sub)
    tile = min(tile, rows // min_sub * min_sub)
    # v7x megacore shards the grid over 2 TensorCores; an odd step count leaves one
    # core idle for the tail. Nudge to an even count if blocks stay >= ~1 MiB.
    steps = _cdiv(rows, tile)
    if steps > 1 and steps % 2 == 1:
        alt = _round_up(_cdiv(rows, steps + 1), min_sub)
        alt = min(alt, rows // min_sub * min_sub)
        if (alt >= min_sub and alt * row_bytes >= _MIN_BLOCK_BYTES
                and _cdiv(rows, alt) % 2 == 0):
            tile = alt
    return tile


def _tile_cols(cols, itemsize, budget_bytes):
    """Column tile for the ragged (1, total) slab: a multiple of 128 lanes."""
    if cols < _LANE or cols * itemsize <= budget_bytes:
        return cols
    tile = max(_LANE, (budget_bytes // itemsize) // _LANE * _LANE)
    return min(tile, cols // _LANE * _LANE)


def _hswish_kernel(x_ref, o_ref):
    # Compute in f32: free for f32 inputs, safe on v5e's f32-only VPU, and the two
    # casts are hidden behind HBM DMA (the kernel is memory-bound).
    x = x_ref[...].astype(jnp.float32)
    o_ref[...] = (x * jnp.clip(x + 3.0, 0.0, 6.0) * (1.0 / 6.0)).astype(o_ref.dtype)


def hswish(x, *, block_bytes=None):
    """Hard-swish: x * relu6(x + 3) / 6, elementwise. Same shape/dtype as input.

    `block_bytes` overrides the per-block byte target (used in tests to exercise
    multi-step grids and partial trailing blocks at small sizes).
    """
    orig_shape = x.shape
    dtype = x.dtype
    if not jnp.issubdtype(dtype, jnp.floating):
        raise TypeError(f"hswish expects a floating-point input, got {dtype}")
    total = int(x.size)
    if total == 0:
        return x

    itemsize = jnp.dtype(dtype).itemsize
    min_sub = _min_sublanes(dtype)
    target, vmem_limit = _block_budget()
    if block_bytes is not None:
        target = int(block_bytes)

    x_flat = jnp.ravel(x)                      # free for contiguous inputs

    # Lane-dense slab: widest candidate W dividing total (prefer rows >= sublane tile).
    divs = [c for c in _W_CANDIDATES if total % c == 0]
    if divs:
        W = next((c for c in divs if total // c >= min_sub), divs[-1])
        rows, cols = total // W, W
        tile_r = _tile_rows(rows, cols * itemsize, min_sub, target)
        tile_c = cols
    else:
        # Ragged total: (1, total) slab; the cdiv grid's masked partial trailing block
        # replaces the old jnp.pad + final slice (no extra full-tensor HBM passes).
        # (1, tile_c) VMEM buffers are sublane-padded 8x, so budget the data at 1/8.
        rows, cols = 1, total
        tile_r = 1
        tile_c = _tile_cols(cols, itemsize, max(target // 8, _LANE * itemsize))

    x2d = x_flat.reshape(rows, cols)

    out2d = pl.pallas_call(
        _hswish_kernel,
        out_shape=jax.ShapeDtypeStruct((rows, cols), dtype),
        grid_spec=pltpu.PrefetchScalarGridSpec(
            num_scalar_prefetch=0,
            grid=(pl.cdiv(rows, tile_r), pl.cdiv(cols, tile_c)),
            in_specs=[pl.BlockSpec((tile_r, tile_c), lambda i, j: (i, j))],
            out_specs=pl.BlockSpec((tile_r, tile_c), lambda i, j: (i, j)),
        ),
        compiler_params=pltpu.CompilerParams(
            dimension_semantics=("parallel", "parallel"),
            vmem_limit_bytes=vmem_limit,
        ),
        # Honors the module's inplace=True: lets XLA reuse the input HBM buffer when
        # the input is a dead intermediate inside a larger graph.
        input_output_aliases={0: 0},
    )(x2d)

    return out2d.reshape(orig_shape)


def _hswish_ref(x):
    xf = x.astype(jnp.float32)
    return (xf * jnp.clip(xf + 3.0, 0.0, 6.0) / 6.0).astype(x.dtype)


if __name__ == "__main__":
    key = jax.random.PRNGKey(0)

    # NCHW f32, matching the PyTorch module's typical conv activations.
    x = jax.random.normal(key, (2, 4, 16, 16), dtype=jnp.float32) * 3.0
    out = jax.block_until_ready(hswish(x))
    assert out.shape == x.shape and out.dtype == x.dtype
    assert jnp.allclose(out, _hswish_ref(x), atol=1e-5, rtol=1e-5), "f32 mismatch vs reference"

    # bf16 path (exercises the 16-sublane tiling).
    xb = jax.random.normal(jax.random.PRNGKey(1), (2, 8, 16, 16), dtype=jnp.bfloat16) * 3.0
    outb = jax.block_until_ready(hswish(xb))
    refb = _hswish_ref(xb)
    assert outb.shape == xb.shape and outb.dtype == xb.dtype
    assert jnp.allclose(outb.astype(jnp.float32), refb.astype(jnp.float32),
                        atol=2e-2, rtol=2e-2), "bf16 mismatch vs reference"

    # Ragged total -> (1, total) slab (no pad / slice extra passes), single block.
    xr = jax.random.normal(jax.random.PRNGKey(2), (3, 5, 7, 11), dtype=jnp.float32) * 3.0
    outr = jax.block_until_ready(hswish(xr))
    assert outr.shape == xr.shape and outr.dtype == xr.dtype
    assert jnp.allclose(outr, _hswish_ref(xr), atol=1e-5, rtol=1e-5), "ragged mismatch vs reference"

    # Multi-step grid with a partial trailing ROW block (rows=10, tile=8 via the small
    # block override) — the same code path production-size tensors take.
    xp = jax.random.normal(jax.random.PRNGKey(3), (1, 8, 40, 128), dtype=jnp.float32) * 3.0
    outp = jax.block_until_ready(hswish(xp, block_bytes=64 * 1024))
    assert outp.shape == xp.shape and outp.dtype == xp.dtype
    assert jnp.allclose(outp, _hswish_ref(xp), atol=1e-5, rtol=1e-5), "partial row-block mismatch"

    # Ragged + multi-step grid with a partial trailing COLUMN block.
    xq = jax.random.normal(jax.random.PRNGKey(4), (3, 5, 7, 11), dtype=jnp.float32) * 3.0
    outq = jax.block_until_ready(hswish(xq, block_bytes=8 * 1024))
    assert outq.shape == xq.shape and outq.dtype == xq.dtype
    assert jnp.allclose(outq, _hswish_ref(xq), atol=1e-5, rtol=1e-5), "partial col-block mismatch"

    print("KERNEL_OK")
</pallas_src>

<mosaic_0001>
module attributes {stable_mosaic.version = 11 : i64} {
  func.func @_hswish_kernel(%arg0: i32, %arg1: i32, %arg2: memref<8x256xf32, #tpu.memory_space<vmem>>, %arg3: memref<8x256xf32, #tpu.memory_space<vmem>>) attributes {dimension_semantics = [#tpu.dimension_semantics<parallel>, #tpu.dimension_semantics<parallel>], iteration_bounds = array<i64: 1, 1>, scalar_prefetch = 0 : i64, scratch_operands = 0 : i64, tpu.core_type = #tpu.core_type<tc>, window_params = [{transform_indices = @transform_0, window_bounds = array<i64: 8, 256>}, {transform_indices = @transform_1, window_bounds = array<i64: 8, 256>}]} {
    %c0 = arith.constant 0 : index
    %c0_0 = arith.constant 0 : index
    %0 = vector.load %arg2[%c0, %c0_0] : memref<8x256xf32, #tpu.memory_space<vmem>>, vector<8x256xf32>
    %cst = arith.constant 3.000000e+00 : f32
    %1 = vector.broadcast %cst : f32 to vector<8x256xf32>
    %2 = arith.addf %0, %1 : vector<8x256xf32>
    %cst_1 = arith.constant 0.000000e+00 : f32
    %cst_2 = arith.constant 6.000000e+00 : f32
    %3 = vector.broadcast %cst_1 : f32 to vector<8x256xf32>
    %4 = arith.maximumf %3, %2 : vector<8x256xf32>
    %5 = vector.broadcast %cst_2 : f32 to vector<8x256xf32>
    %6 = arith.minimumf %5, %4 : vector<8x256xf32>
    %7 = arith.mulf %0, %6 : vector<8x256xf32>
    %cst_3 = arith.constant 0.166666672 : f32
    %8 = vector.broadcast %cst_3 : f32 to vector<8x256xf32>
    %9 = arith.mulf %7, %8 : vector<8x256xf32>
    %c0_4 = arith.constant 0 : index
    %c0_5 = arith.constant 0 : index
    %10 = vector.load %arg3[%c0_4, %c0_5] : memref<8x256xf32, #tpu.memory_space<vmem>>, vector<8x256xf32>
    tpu.vector_store %arg3[%c0_4, %c0_5], %9 {strides = array<i32>} : memref<8x256xf32, #tpu.memory_space<vmem>>, vector<8x256xf32>,
    return
  }
  func.func @transform_0(%arg0: i32, %arg1: i32) -> (i32, i32) {
    %c0_i32 = arith.constant 0 : i32
    return %arg0, %arg1 : i32, i32
  }
  func.func @transform_1(%arg0: i32, %arg1: i32) -> (i32, i32) {
    %c0_i32 = arith.constant 0 : i32
    return %arg0, %arg1 : i32, i32
  }
}

</mosaic_0001>

<bundles_post_ra>
// kernel: tpu_custom_call.1
= control target key start
LH: loop header
LB: loop body
LE: loop exit
PB: predicated region body
PF: predicated region fallthrough
CT: control target
= control target key end

     0   :  { %6 = vsyncpa [#allocation3], 0  ;;  %s126_s0 = inlined_call_operand.hbm [shape: f32[8,256], index: 0, kind: input, shape index: {}, may-alias: {0,1}]   ;;  %s127_s1 = inlined_call_operand.hbm [shape: f32[8,256], index: 1, kind: output, shape index: {}, may-alias: {0,1}]  }
   0x1   :  { %7 = vsyncpa [#allocation4], 0  ;;  %s13_s8 = sshll.u32 %s126_s0, 4  ;;  %s108_s9 = smov [#allocation2]   ;;  %s14_s8 = int_to_ptr.hbm [resolvable:$true] %s13_s8 }
   0x2   :  { %s15_s10 = sshll.u32 %s108_s9, 4  ;;  %s16_s10 = int_to_ptr.vmem [resolvable:$true] %s15_s10 }
   0x3   :  { %18 = dma.hbm_to_vmem [thread:$0]  %s14_s8, 256, %s16_s10, [#allocation3]  }
   0x4   :  { %104 = dma.done.wait [#allocation3], 256  }
   0x5   :  { %105 = vsyncadd [#allocation3], 4294967040  ;;  %v23_v0 = vld [vmem:[#allocation2] sm:$0xff]  ;;  %v24_v1 = vld [vmem:[#allocation2 + $0x8] sm:$0xff]  ;;  %s109_s11 = smov [#allocation5]   ;;  %s44_s14 = sshll.u32 %s127_s1, 4  ;;  %s45_s14 = int_to_ptr.hbm [resolvable:$true] %s44_s14 }
   0x6   :  { %v25_v2 = vadd.f32 3.0, %v23_v0  ;;  %v26_v3 = vadd.f32 3.0, %v24_v1  ;;  %s42_s12 = sshll.u32 %s109_s11, 4  ;;  %s43_s12 = int_to_ptr.vmem [resolvable:$true] %s42_s12 }
   0x8   :  { %v27_v4 = vmax.f32 %v25_v2, 0.0  ;;  %v28_v5 = vmax.f32 %v26_v3, 0.0 }
   0xa   :  { %v29_v6 = vmin.f32 %v27_v4, 6.0  ;;  %v30_v7 = vmin.f32 %v28_v5, 6.0 }
   0xc   :  { %v31_v8 = vmul.f32 %v29_v6, %v23_v0  ;;  %v32_v9 = vmul.f32 %v30_v7, %v24_v1 }
   0xe   :  { %v33_v10 = vmul.f32 0.16666667, %v31_v8  ;;  %v34_v11 = vmul.f32 0.16666667, %v32_v9 }
  0x10   :  { %35 = vst [vmem:[#allocation5] sm:$0xff] %v33_v10 }
  0x11   :  { %36 = vst [vmem:[#allocation5 + $0x8] sm:$0xff] %v34_v11 }
  0x12   :  { %47 = dma.vmem_to_hbm [thread:$0]  %s43_s12, 256, %s45_s14, [#allocation4]  }
  0x13   :  { %106 = dma.done.wait [#allocation4], 256  }
  0x14   :  { %107 = vsyncadd [#allocation4], 4294967040 }
  0x15   :  { %52 = vsyncpa [#allocation3], 1 }
  0x16   :  { %53 = vsyncpa [#allocation4], 1 }

</bundles_post_ra>
